<compile_context>
chip_gen: v5e
topology: v5e:2x2
jax: 0.10.0
libtpu: 0.0.40
codegen_flags: <defaults>
</compile_context>

<pallas_src>
import jax
import jax.numpy as jnp
from jax.experimental import pallas as pl
from jax.experimental.pallas import tpu as pltpu


def _pe_slice_dma_kernel(w_hbm_ref, out_hbm_ref, copy_sem):
    """Copy the first `seq_len` rows of the PE table with one DMA descriptor.

    w_hbm_ref:   (max_len, d_model) embedding table, left in HBM (pl.ANY).
    out_hbm_ref: (seq_len, d_model) output slab, left in HBM (pl.ANY).
    copy_sem:    scalar DMA semaphore.

    The slice is a contiguous prefix of the table, so a single HBM->HBM DMA moves
    the whole slab at full DMA bandwidth; the vector units are never touched.
    """
    seq_len = out_hbm_ref.shape[0]  # static
    cp = pltpu.make_async_copy(w_hbm_ref.at[:seq_len, :], out_hbm_ref, copy_sem)
    cp.start()
    cp.wait()


def learnable_positional_embedding(weight: jax.Array, seq_len: int) -> jax.Array:
    """weight: (1, max_len, d_model). Returns weight[:, :seq_len, :] -> (1, seq_len, d_model)."""
    _, max_len, d_model = weight.shape
    if not (0 < seq_len <= max_len):
        raise ValueError(f"seq_len={seq_len} must be in (0, {max_len}]")

    w2d = jnp.squeeze(weight, axis=0)  # (max_len, d_model); free squeeze of size-1 dim
    nbytes = int(seq_len) * int(d_model) * w2d.dtype.itemsize

    out2d = pl.pallas_call(
        _pe_slice_dma_kernel,
        out_shape=jax.ShapeDtypeStruct((seq_len, d_model), w2d.dtype),
        # Keep both operands in HBM; the kernel issues the DMA itself.
        in_specs=[pl.BlockSpec(memory_space=pl.ANY)],
        out_specs=pl.BlockSpec(memory_space=pl.ANY),
        scratch_shapes=[pltpu.SemaphoreType.DMA(())],
        cost_estimate=pl.CostEstimate(
            flops=0, transcendentals=0, bytes_accessed=2 * nbytes
        ),
    )(w2d)

    return out2d[None, :, :]  # (1, seq_len, d_model)


class LearnablePositionalEmbeddingJAX:
    """Mirror of the PyTorch module; parameters initialized deterministically in-script."""

    def __init__(self, d_model: int, max_len: int = 512, key=None):
        if key is None:
            key = jax.random.PRNGKey(0)
        # pe = 0.1 * randn(max_len, d_model); unsqueeze(0)
        pe = 0.1 * jax.random.normal(key, (max_len, d_model), dtype=jnp.float32)
        self.weight = pe[None, :, :]  # (1, max_len, d_model)

    def __call__(self, x: jax.Array) -> jax.Array:
        # x: (batch, seq, feature); only x.shape[1] (Dim.seq) is used.
        seq_len = x.shape[1]
        return learnable_positional_embedding(self.weight, seq_len)


# TODO(synk): in a full model, fuse the downstream `x + pe` add into the consumer's
# kernel so this read of the PE table is amortized against real compute.


if __name__ == "__main__":
    key = jax.random.PRNGKey(0)
    k_w, k_x = jax.random.split(key)

    d_model = 32
    max_len = 512
    batch, seq = 2, 8

    module = LearnablePositionalEmbeddingJAX(d_model, max_len, key=k_w)
    x = jax.random.normal(k_x, (batch, seq, d_model), dtype=jnp.float32)

    out = module(x)
    out = jax.block_until_ready(out)

    # Reference check against plain JAX slice (exact copy expected).
    ref = module.weight[:, :seq, :]
    assert out.shape == (1, seq, d_model), out.shape
    assert jnp.array_equal(out, ref), "mismatch vs reference slice"

    print("KERNEL_OK")
</pallas_src>

<mosaic_0001>
module attributes {stable_mosaic.version = 11 : i64} {
  func.func @_pe_slice_dma_kernel(%arg0: memref<512x32xf32, #tpu.memory_space<any>>, %arg1: memref<8x32xf32, #tpu.memory_space<any>>, %arg2: memref<!tpu.dma_semaphore, #tpu.memory_space<semaphore_mem>>) attributes {dimension_semantics = [], scalar_prefetch = 0 : i64, scratch_operands = 1 : i64, tpu.core_type = #tpu.core_type<tc>} {
    %c0_i32 = arith.constant 0 : i32
    %c0_i32_0 = arith.constant 0 : i32
    %0 = tpu.memref_slice %arg0[%c0_i32, %c0_i32_0] : memref<512x32xf32, #tpu.memory_space<any>> -> memref<8x32xf32, #tpu.memory_space<any>>
    tpu.enqueue_dma source(%0 : memref<8x32xf32, #tpu.memory_space<any>>) target(%arg1 : memref<8x32xf32, #tpu.memory_space<any>>) target_semaphore(%arg2 : memref<!tpu.dma_semaphore, #tpu.memory_space<semaphore_mem>>)
    %c0_i32_1 = arith.constant 0 : i32
    %c0_i32_2 = arith.constant 0 : i32
    %1 = tpu.memref_slice %arg0[%c0_i32_1, %c0_i32_2] : memref<512x32xf32, #tpu.memory_space<any>> -> memref<8x32xf32, #tpu.memory_space<any>>
    tpu.wait_dma2 semaphore(%arg2 : memref<!tpu.dma_semaphore, #tpu.memory_space<semaphore_mem>>) src(%1 : memref<8x32xf32, #tpu.memory_space<any>>) dst(%arg1 : memref<8x32xf32, #tpu.memory_space<any>>)
    return
  }
}

</mosaic_0001>

<bundles_post_ra>
// kernel: tpu_custom_call.1
= control target key start
LH: loop header
LB: loop body
LE: loop exit
PB: predicated region body
PF: predicated region fallthrough
CT: control target
= control target key end

     0   :  { %s71_s0 = inlined_call_operand.vmem [shape: f32[512,32], index: 0, kind: input, shape index: {}]   ;;  %s72_s1 = inlined_call_operand.hbm [shape: f32[8,32], index: 1, kind: output, shape index: {}]  }
   0x1   :  { %s13_s8 = sshll.u32 %s71_s0, 4  ;;  %s15_s11 = sshll.u32 %s72_s1, 4  ;;  %s14_s8 = int_to_ptr.vmem [resolvable:$true] %s13_s8  ;;  %s16_s11 = int_to_ptr.hbm [resolvable:$true] %s15_s11 }
   0x2   :  { %18 = dma.vmem_to_hbm [thread:$0]  %s14_s8, 128, %s16_s11, [#allocation2] }
   0x3   :  { %53 = dma.done.wait [#allocation2], 128 }
   0x4   :  { %54 = vsyncadd [#allocation2], 4294967168 }
   0x5   :  { %22 = vsyncmov [#allocation2] }
   0x8   :  { %s23_s12 = vpop.sfrf %22 }
   0x9   :  { %p28_p0 = scmp.ne.s32.totalorder %s23_s12, 0 }
   0xb   :  { %27 = shalt.err (%p28_p0)  }

</bundles_post_ra>
